<compile_context>
chip_gen: v5e
topology: v5e:2x2
jax: 0.10.0
libtpu: 0.0.40
codegen_flags: <defaults>
</compile_context>

<pallas_src>
import math

import jax
import jax.numpy as jnp
from jax.experimental import pallas as pl
from jax.experimental.pallas import tpu as pltpu


def _round_up(n, m):
    return ((n + m - 1) // m) * m


def _cdiv(a, b):
    return -(-a // b)


def ddpg_critic_kernel(x_ref, y_ref, w0x_ref, w0y_ref, b0_ref,
                       w1_ref, b1_ref, w2_ref, b2_ref, o_ref):
    """One batch tile of the forward pass; weights are VMEM-resident."""
    # Streamed activations arrive as bf16; upcast once on the VPU (memory-bound
    # kernel, the cast is free) so all matmul math stays f32 like the reference.
    x = x_ref[...].astype(jnp.float32)
    y = y_ref[...].astype(jnp.float32)

    # input layer: fused "concat" via split matmuls, NO activation (matches ref)
    h0 = (jnp.dot(x, w0x_ref[...], preferred_element_type=jnp.float32)
          + jnp.dot(y, w0y_ref[...], preferred_element_type=jnp.float32)
          + b0_ref[...])

    # l1 layer: Linear(H -> H) + ReLU
    h1 = jnp.dot(h0, w1_ref[...], preferred_element_type=jnp.float32) + b1_ref[...]
    h1 = jnp.maximum(h1, 0.0)

    # out layer: Linear(H -> 1).  Contract w2 (1, H) against h1 (tb, H) over H
    # (rhs-transposed dot_general, same pattern as the flash-attention q.k^T
    # contraction) so the result is a lane-dense (1, tb) row - no (tb, 1)
    # column, no masked narrow stores.
    out_row = jax.lax.dot_general(
        w2_ref[...], h1,
        dimension_numbers=(((1,), (1,)), ((), ())),
        preferred_element_type=jnp.float32) + b2_ref[0, 0]

    o_ref[...] = out_row.astype(o_ref.dtype)


def ddpg_critic_forward(x, y, params, *, block_rows=4096):
    """x: (B, n_states), y: (B, n_actions). Returns (B, 1) float32."""
    w0x, w0y, b0, w1, b1, w2_row, b2 = params
    B, S = x.shape
    A = y.shape[1]
    H = w1.shape[0]

    # Stream the bandwidth-dominant activations in bf16 (weights stay f32).
    x = x.astype(jnp.bfloat16)
    y = y.astype(jnp.bfloat16)

    # Batch tiling: no padded copy of the inputs.  The grid is ragged
    # (grid = cdiv(B, tb)); the last block may read past B, but rows are
    # independent so only output lanes >= B are garbage and they get sliced
    # off below.  For B >= 256 use at least 2 blocks so both v7x TensorCores
    # get work; multi-block tiles are 128-aligned so the (1, tb) output block
    # stays lane-dense.
    if B > block_rows:
        nblk = _cdiv(B, block_rows)
    elif B >= 256:
        nblk = 2
    else:
        nblk = 1

    if nblk == 1:
        tb = _round_up(max(B, 1), 16)           # 16: bf16 sublane packing
    else:
        tb = _round_up(_cdiv(B, nblk), 128)
    grid_len = _cdiv(B, tb)
    Bp = grid_len * tb

    def resident(shape):
        # Full-array block with a constant index -> fetched once, stays in VMEM.
        return pl.BlockSpec(shape, lambda i: (0, 0))

    out = pl.pallas_call(
        ddpg_critic_kernel,
        out_shape=jax.ShapeDtypeStruct((1, Bp), jnp.float32),
        grid_spec=pltpu.PrefetchScalarGridSpec(
            num_scalar_prefetch=0,
            grid=(grid_len,),
            in_specs=[
                pl.BlockSpec((tb, S), lambda i: (i, 0)),   # x tile (bf16)
                pl.BlockSpec((tb, A), lambda i: (i, 0)),   # y tile (bf16)
                resident((S, H)),                          # w0x
                resident((A, H)),                          # w0y
                resident((1, H)),                          # b0
                resident((H, H)),                          # w1
                resident((1, H)),                          # b1
                resident((1, H)),                          # w2 (row)
                pl.BlockSpec((1, 1), lambda i: (0, 0),     # b2 scalar in SMEM
                             memory_space=pltpu.MemorySpace.SMEM),
            ],
            # Lane-dense output: one (1, tb) row per grid step.
            out_specs=pl.BlockSpec((1, tb), lambda i: (0, i)),
        ),
        compiler_params=pltpu.CompilerParams(
            dimension_semantics=("parallel",)),
    )(x, y, w0x, w0y, b0, w1, b1, w2_row, b2)

    return out[0, :B].reshape(B, 1)


def init_linear_params(key, fan_in, fan_out):
    """PyTorch-style nn.Linear init: U(-1/sqrt(fan_in), +1/sqrt(fan_in))."""
    kw, kb = jax.random.split(key)
    bound = 1.0 / math.sqrt(fan_in)
    # stored as (in, out) so the kernel computes x @ W
    w = jax.random.uniform(kw, (fan_in, fan_out), jnp.float32, -bound, bound)
    b = jax.random.uniform(kb, (1, fan_out), jnp.float32, -bound, bound)
    return w, b


if __name__ == "__main__":
    # Small shapes consistent with the module.
    batch = 32
    n_states = 16
    n_actions = 8
    n_hidden = 32

    key = jax.random.PRNGKey(0)
    k_x, k_y, k0, k1, k2 = jax.random.split(key, 5)

    x = jax.random.normal(k_x, (batch, n_states), jnp.float32)
    y = jax.random.normal(k_y, (batch, n_actions), jnp.float32)

    # input layer: init with fan_in = n_states + n_actions, then split so the
    # kernel can skip the concat.
    w0, b0 = init_linear_params(k0, n_states + n_actions, n_hidden)
    w0x, w0y = w0[:n_states], w0[n_states:]
    w1, b1 = init_linear_params(k1, n_hidden, n_hidden)
    w2, b2 = init_linear_params(k2, n_hidden, 1)          # w2: (H, 1), b2: (1, 1)
    w2_row = w2.T                                         # (1, H) row for the final contraction

    params = (w0x, w0y, b0, w1, b1, w2_row, b2)

    out = ddpg_critic_forward(x, y, params)
    out = jax.block_until_ready(out)

    # Pure-JAX reference of the same math (concat form), with the same bf16
    # input quantization the kernel applies to the streamed activations.
    xq = x.astype(jnp.bfloat16).astype(jnp.float32)
    yq = y.astype(jnp.bfloat16).astype(jnp.float32)
    xy = jnp.concatenate([xq, yq], axis=1)
    h0 = xy @ jnp.concatenate([w0x, w0y], axis=0) + b0
    h1 = jnp.maximum(h0 @ w1 + b1, 0.0)
    ref = h1 @ w2 + b2

    assert out.shape == (batch, 1)
    assert jnp.allclose(out, ref, atol=1e-4, rtol=1e-4)

    print("KERNEL_OK")
</pallas_src>

<mosaic_0001>
module attributes {stable_mosaic.version = 11 : i64} {
  func.func @ddpg_critic_kernel(%arg0: i32, %arg1: memref<32x16xbf16, #tpu.memory_space<vmem>>, %arg2: memref<32x8xbf16, #tpu.memory_space<vmem>>, %arg3: memref<16x32xf32, #tpu.memory_space<vmem>>, %arg4: memref<8x32xf32, #tpu.memory_space<vmem>>, %arg5: memref<1x32xf32, #tpu.memory_space<vmem>>, %arg6: memref<32x32xf32, #tpu.memory_space<vmem>>, %arg7: memref<1x32xf32, #tpu.memory_space<vmem>>, %arg8: memref<1x32xf32, #tpu.memory_space<vmem>>, %arg9: memref<1x1xf32, #tpu.memory_space<smem>>, %arg10: memref<1x32xf32, #tpu.memory_space<vmem>>) attributes {dimension_semantics = [#tpu.dimension_semantics<parallel>], iteration_bounds = array<i64: 1>, scalar_prefetch = 0 : i64, scratch_operands = 0 : i64, tpu.core_type = #tpu.core_type<tc>, window_params = [{transform_indices = @transform_0, window_bounds = array<i64: 32, 16>}, {transform_indices = @transform_1, window_bounds = array<i64: 32, 8>}, {pipeline_mode = #tpu.pipeline_mode<synchronous>, transform_indices = @transform_2, window_bounds = array<i64: 16, 32>}, {pipeline_mode = #tpu.pipeline_mode<synchronous>, transform_indices = @transform_3, window_bounds = array<i64: 8, 32>}, {pipeline_mode = #tpu.pipeline_mode<synchronous>, transform_indices = @transform_4, window_bounds = array<i64: 1, 32>}, {pipeline_mode = #tpu.pipeline_mode<synchronous>, transform_indices = @transform_5, window_bounds = array<i64: 32, 32>}, {pipeline_mode = #tpu.pipeline_mode<synchronous>, transform_indices = @transform_6, window_bounds = array<i64: 1, 32>}, {pipeline_mode = #tpu.pipeline_mode<synchronous>, transform_indices = @transform_7, window_bounds = array<i64: 1, 32>}, {transform_indices = @transform_8, window_bounds = array<i64: 1, 1>}, {transform_indices = @transform_9, window_bounds = array<i64: 1, 32>}]} {
    %c0 = arith.constant 0 : index
    %c0_0 = arith.constant 0 : index
    %0 = vector.load %arg1[%c0, %c0_0] : memref<32x16xbf16, #tpu.memory_space<vmem>>, vector<32x16xbf16>
    %1 = arith.extf %0 : vector<32x16xbf16> to vector<32x16xf32>
    %c0_1 = arith.constant 0 : index
    %c0_2 = arith.constant 0 : index
    %2 = vector.load %arg2[%c0_1, %c0_2] : memref<32x8xbf16, #tpu.memory_space<vmem>>, vector<32x8xbf16>
    %3 = arith.extf %2 : vector<32x8xbf16> to vector<32x8xf32>
    %c0_3 = arith.constant 0 : index
    %c0_4 = arith.constant 0 : index
    %4 = vector.load %arg3[%c0_3, %c0_4] : memref<16x32xf32, #tpu.memory_space<vmem>>, vector<16x32xf32>
    %cst = arith.constant dense<0.000000e+00> : vector<32x32xf32>
    %5 = tpu.matmul %1, %4, %cst {dimension_numbers = #tpu.dot_dimension_numbers<[1], [0], [0], [1], [0, 0, 1, 1], [], []>} : vector<32x16xf32>, vector<16x32xf32>, vector<32x32xf32> -> vector<32x32xf32>
    %c0_5 = arith.constant 0 : index
    %c0_6 = arith.constant 0 : index
    %6 = vector.load %arg4[%c0_5, %c0_6] : memref<8x32xf32, #tpu.memory_space<vmem>>, vector<8x32xf32>
    %cst_7 = arith.constant dense<0.000000e+00> : vector<32x32xf32>
    %7 = tpu.matmul %3, %6, %cst_7 {dimension_numbers = #tpu.dot_dimension_numbers<[1], [0], [0], [1], [0, 0, 1, 1], [], []>} : vector<32x8xf32>, vector<8x32xf32>, vector<32x32xf32> -> vector<32x32xf32>
    %8 = arith.addf %5, %7 : vector<32x32xf32>
    %c0_8 = arith.constant 0 : index
    %c0_9 = arith.constant 0 : index
    %9 = vector.load %arg5[%c0_8, %c0_9] : memref<1x32xf32, #tpu.memory_space<vmem>>, vector<1x32xf32>
    %10 = vector.broadcast %9 : vector<1x32xf32> to vector<32x32xf32>
    %11 = arith.addf %8, %10 : vector<32x32xf32>
    %c0_10 = arith.constant 0 : index
    %c0_11 = arith.constant 0 : index
    %12 = vector.load %arg6[%c0_10, %c0_11] : memref<32x32xf32, #tpu.memory_space<vmem>>, vector<32x32xf32>
    %cst_12 = arith.constant dense<0.000000e+00> : vector<32x32xf32>
    %13 = tpu.matmul %11, %12, %cst_12 {dimension_numbers = #tpu.dot_dimension_numbers<[1], [0], [0], [1], [0, 0, 1, 1], [], []>} : vector<32x32xf32>, vector<32x32xf32>, vector<32x32xf32> -> vector<32x32xf32>
    %c0_13 = arith.constant 0 : index
    %c0_14 = arith.constant 0 : index
    %14 = vector.load %arg7[%c0_13, %c0_14] : memref<1x32xf32, #tpu.memory_space<vmem>>, vector<1x32xf32>
    %15 = vector.broadcast %14 : vector<1x32xf32> to vector<32x32xf32>
    %16 = arith.addf %13, %15 : vector<32x32xf32>
    %cst_15 = arith.constant 0.000000e+00 : f32
    %17 = vector.broadcast %cst_15 : f32 to vector<32x32xf32>
    %18 = arith.maximumf %16, %17 : vector<32x32xf32>
    %c0_16 = arith.constant 0 : index
    %c0_17 = arith.constant 0 : index
    %19 = vector.load %arg8[%c0_16, %c0_17] : memref<1x32xf32, #tpu.memory_space<vmem>>, vector<1x32xf32>
    %cst_18 = arith.constant dense<0.000000e+00> : vector<1x32xf32>
    %20 = tpu.matmul %19, %18, %cst_18 {dimension_numbers = #tpu.dot_dimension_numbers<[1], [1], [0], [0], [0, 0, 1, 0], [], []>} : vector<1x32xf32>, vector<32x32xf32>, vector<1x32xf32> -> vector<1x32xf32>
    %c0_19 = arith.constant 0 : index
    %c0_20 = arith.constant 0 : index
    %21 = memref.load %arg9[%c0_19, %c0_20] : memref<1x1xf32, #tpu.memory_space<smem>>
    %22 = vector.broadcast %21 : f32 to vector<1x32xf32>
    %23 = arith.addf %20, %22 : vector<1x32xf32>
    %c0_21 = arith.constant 0 : index
    %c0_22 = arith.constant 0 : index
    %24 = vector.load %arg10[%c0_21, %c0_22] : memref<1x32xf32, #tpu.memory_space<vmem>>, vector<1x32xf32>
    tpu.vector_store %arg10[%c0_21, %c0_22], %23 {strides = array<i32>} : memref<1x32xf32, #tpu.memory_space<vmem>>, vector<1x32xf32>,
    return
  }
  func.func @transform_0(%arg0: i32) -> (i32, i32) {
    %c0_i32 = arith.constant 0 : i32
    %c0_i32_0 = arith.constant 0 : i32
    return %arg0, %c0_i32 : i32, i32
  }
  func.func @transform_1(%arg0: i32) -> (i32, i32) {
    %c0_i32 = arith.constant 0 : i32
    %c0_i32_0 = arith.constant 0 : i32
    return %arg0, %c0_i32 : i32, i32
  }
  func.func @transform_2(%arg0: i32) -> (i32, i32) {
    %c0_i32 = arith.constant 0 : i32
    %c0_i32_0 = arith.constant 0 : i32
    %c0_i32_1 = arith.constant 0 : i32
    return %c0_i32, %c0_i32_0 : i32, i32
  }
  func.func @transform_3(%arg0: i32) -> (i32, i32) {
    %c0_i32 = arith.constant 0 : i32
    %c0_i32_0 = arith.constant 0 : i32
    %c0_i32_1 = arith.constant 0 : i32
    return %c0_i32, %c0_i32_0 : i32, i32
  }
  func.func @transform_4(%arg0: i32) -> (i32, i32) {
    %c0_i32 = arith.constant 0 : i32
    %c0_i32_0 = arith.constant 0 : i32
    %c0_i32_1 = arith.constant 0 : i32
    return %c0_i32, %c0_i32_0 : i32, i32
  }
  func.func @transform_5(%arg0: i32) -> (i32, i32) {
    %c0_i32 = arith.constant 0 : i32
    %c0_i32_0 = arith.constant 0 : i32
    %c0_i32_1 = arith.constant 0 : i32
    return %c0_i32, %c0_i32_0 : i32, i32
  }
  func.func @transform_6(%arg0: i32) -> (i32, i32) {
    %c0_i32 = arith.constant 0 : i32
    %c0_i32_0 = arith.constant 0 : i32
    %c0_i32_1 = arith.constant 0 : i32
    return %c0_i32, %c0_i32_0 : i32, i32
  }
  func.func @transform_7(%arg0: i32) -> (i32, i32) {
    %c0_i32 = arith.constant 0 : i32
    %c0_i32_0 = arith.constant 0 : i32
    %c0_i32_1 = arith.constant 0 : i32
    return %c0_i32, %c0_i32_0 : i32, i32
  }
  func.func @transform_8(%arg0: i32) -> (i32, i32) {
    %c0_i32 = arith.constant 0 : i32
    %c0_i32_0 = arith.constant 0 : i32
    %c0_i32_1 = arith.constant 0 : i32
    return %c0_i32, %c0_i32_0 : i32, i32
  }
  func.func @transform_9(%arg0: i32) -> (i32, i32) {
    %c0_i32 = arith.constant 0 : i32
    %c0_i32_0 = arith.constant 0 : i32
    return %c0_i32, %arg0 : i32, i32
  }
}

</mosaic_0001>

<bundles_post_ra>
// kernel: tpu_custom_call.1
= control target key start
LH: loop header
LB: loop body
LE: loop exit
PB: predicated region body
PF: predicated region fallthrough
CT: control target
= control target key end

     0   :  { %15 = vsyncpa [#allocation4], 0  ;;  %s481_s0 = inlined_call_operand.vmem [shape: bf16[32,16], index: 0, kind: input, shape index: {}]   ;;  %s482_s1 = inlined_call_operand.vmem [shape: bf16[32,8], index: 1, kind: input, shape index: {}]   ;;  %s483_s2 = inlined_call_operand.hbm [shape: f32[16,32], index: 2, kind: input, shape index: {}]   ;;  %s484_s3 = inlined_call_operand.vmem [shape: f32[8,32], index: 3, kind: input, shape index: {}]   ;;  %s485_s4 = inlined_call_operand.vmem [shape: f32[1,32], index: 4, kind: input, shape index: {}]   ;;  %s486_s5 = inlined_call_operand.vmem [shape: f32[32,32], index: 5, kind: input, shape index: {}]   ;;  %s487_s6 = inlined_call_operand.vmem [shape: f32[1,32], index: 6, kind: input, shape index: {}]   ;;  %s488_s7 = inlined_call_operand.vmem [shape: f32[1,32], index: 7, kind: input, shape index: {}]   ;;  %s489_s8 = inlined_call_operand.<no memory space> [shape: f32[1,1], index: 8, kind: input, shape index: {}]   ;;  %s490_s9 = inlined_call_operand.hbm [shape: f32[1,32], index: 9, kind: output, shape index: {}]  }
   0x1   :  { %16 = vsyncpa [#allocation5], 0  ;;  %s25_s11 = sshll.u32 %s483_s2, 4  ;;  %s365_s12 = smov [#allocation3]   ;;  %s26_s11 = int_to_ptr.hbm [resolvable:$true] %s25_s11 }
   0x2   :  { %s27_s13 = sshll.u32 %s365_s12, 4  ;;  %s366_s14 = smov 128   ;;  %s28_s13 = int_to_ptr.vmem [resolvable:$true] %s27_s13 }
   0x3   :  { %s367_s15 = smov 8  }
   0x4   :  { %33 = dma.hbm_to_vmem [thread:$0]  %s26_s11, 256, %s28_s13, [#allocation4], %s366_s14, %s366_s14, %s367_s15  }
   0x5   :  { %361 = dma.done.wait [#allocation4], 256  }
   0x6   :  { %362 = vsyncadd [#allocation4], 4294967040  ;;  %v67_v0 = vld [vmem:[#allocation3 + $0x8] sm:$0xff]  ;;  %v68_v1 = vld [vmem:[%s484_s3] sm:$0xff]  ;;  %vm69_vm0 = vcmask 64512   ;;  %vm111_vm1 = vcmask 130048   ;;  %v217_v50 = vstv %s489_s8 }
   0x7   :  { %v66_v2 = vld [vmem:[#allocation3] sm:$0xff]  ;;  %138 = vmatpush.msra.mxu1 %v67_v0  ;;  %97 = vmatpush.msra.mxu0 %v68_v1  ;;  %v164_v7 = vld [vmem:[%s486_s5 + $0x18] sm:$0xff]  ;;  %v306_v10 = vld [vmem:[%s482_s1 + $0x8] sm:$0xff]   ;;  %vm169_vm2 = vcmask 261120   ;;  %s368_s14 = smov [#allocation6]   ;;  %s262_s18 = sshll.u32 %s490_s9, 4  ;;  %s263_s18 = int_to_ptr.hbm [resolvable:$true] %s262_s18 }
   0x8   :  { %v298_v3 = vld [vmem:[%s482_s1] sm:$0xff]   ;;  %194 = vmatpush.msra.mxu2 %v164_v7  ;;  %v305_v11 = vld [vmem:[%s481_s0 + $0x8] sm:$0xff]   ;;  %v303_v12 = vunpack.c.l.bf16 %v306_v10  ;;  %v304_v14 = vunpack.c.h.bf16 %v306_v10  ;;  %v163_v16 = vld [vmem:[%s486_s5 + $0x10] sm:$0xff]  ;;  %s260_s15 = sshll.u32 %s368_s14, 4  ;;  %vm253_vm3 = vcmask 253952   ;;  %s261_s15 = int_to_ptr.vmem [resolvable:$true] %s260_s15 }
   0x9   :  { %v290_v4 = vld [vmem:[%s481_s0] sm:$0xff]   ;;  %v299_v5 = vunpack.c.l.bf16 %v298_v3  ;;  %139 = vmatpush.msra.mxu1 %v66_v2  ;;  %v300_v8 = vunpack.c.h.bf16 %v298_v3  ;;  %v295_v13 = vunpack.c.l.bf16 %v305_v11  ;;  %v296_v15 = vunpack.c.h.bf16 %v305_v11  ;;  %v162_v17 = vld [vmem:[%s486_s5 + $0x8] sm:$0xff] }
   0xa   :  { %v291_v6 = vunpack.c.l.bf16 %v290_v4  ;;  %v292_v9 = vunpack.c.h.bf16 %v290_v4  ;;  %195 = vmatpush.msra.mxu2 %v163_v16  ;;  %v161_v18 = vld [vmem:[%s486_s5] sm:$0xff] }
   0xb   :  { %272 = vmatmul.msk.f32.vlgmr.msra.gmra.mxu0 %vm69_vm0, %v299_v5  ;;  %v311_v19 = vld [vmem:[%s485_s4] ss:$0 sm:$0xff] }
   0xc   :  { %276 = vmatmul.msk.f32.vlgmr.msra.gmra.mxu1 %vm111_vm1, %v291_v6  ;;  %196 = vmatpush.msra.mxu2 %v162_v17  ;;  %v312_v39 = vld [vmem:[%s487_s6] ss:$0 sm:$0xff] }
   0xd   :  { %v215_v49 = vld [vmem:[%s488_s7] sm:$0x1] }
   0xe   :  { %197 = vmatpush.msra.mxu2 %v161_v18 }
  0x13   :  { %273 = vmatmul.msk.f32.gmra.mxu0 %vm69_vm0, %v300_v8 }
  0x14   :  { %277 = vmatmul.msk.f32.gmra.mxu1 %vm111_vm1, %v292_v9 }
  0x1b   :  { %274 = vmatmul.msk.f32.gmra.mxu0 %vm69_vm0, %v303_v12 }
  0x1c   :  { %278 = vmatmul.msk.f32.gmra.mxu1 %vm111_vm1, %v295_v13 }
  0x23   :  { %275 = vmatmul.msk.f32.gmra.mxu0 %vm69_vm0, %v304_v14 }
  0x24   :  { %279 = vmatmul.msk.f32.gmra.mxu1 %vm111_vm1, %v296_v15 }
  0x88   :  { %v99_v20 = vpop.f32.mrf.mxu0 }
  0x89   :  { %v141_v21 = vpop.f32.mrf.mxu1 }
  0x8a   :  { %v142_v22 = vadd.f32 %v141_v21, %v99_v20 }
  0x8c   :  { %v157_v23 = vadd.f32 %v311_v19, %v142_v22 }
  0x8e   :  { %280 = vmatmul.msk.f32.vlgmr.msra.gmra.mxu2 %vm169_vm2, %v157_v23 }
  0x90   :  { %v102_v24 = vpop.f32.mrf.mxu0 }
  0x91   :  { %v144_v25 = vpop.f32.mrf.mxu1 }
  0x92   :  { %v145_v26 = vadd.f32 %v144_v25, %v102_v24 }
  0x94   :  { %v158_v27 = vadd.f32 %v311_v19, %v145_v26 }
  0x96   :  { %281 = vmatmul.msk.f32.gmra.mxu2 %vm169_vm2, %v158_v27 }
  0x98   :  { %v105_v28 = vpop.f32.mrf.mxu0 }
  0x99   :  { %v147_v29 = vpop.f32.mrf.mxu1 }
  0x9a   :  { %v148_v30 = vadd.f32 %v147_v29, %v105_v28 }
  0x9c   :  { %v159_v31 = vadd.f32 %v311_v19, %v148_v30 }
  0x9e   :  { %282 = vmatmul.msk.f32.gmra.mxu2 %vm169_vm2, %v159_v31 }
  0xa0   :  { %v108_v32 = vpop.f32.mrf.mxu0 }
  0xa1   :  { %v150_v33 = vpop.f32.mrf.mxu1 }
  0xa2   :  { %v151_v34 = vadd.f32 %v150_v33, %v108_v32 }
  0xa4   :  { %v160_v35 = vadd.f32 %v311_v19, %v151_v34 }
  0xa6   :  { %283 = vmatmul.msk.f32.gmra.mxu2 %vm169_vm2, %v160_v35 }
 0x111   :  { %v199_v36 = vpop.f32.mrf.mxu2 }
 0x112   :  { %v200_v46 = vadd.f32 %v312_v39, %v199_v36 }
 0x114   :  { %v211_v48 = vmax.f32 %v200_v46, 0.0 }
 0x119   :  { %v202_v37 = vpop.f32.mrf.mxu2 }
 0x11a   :  { %v203_v44 = vadd.f32 %v312_v39, %v202_v37 }
 0x11c   :  { %v212_v47 = vmax.f32 %v203_v44, 0.0 }
 0x121   :  { %v205_v38 = vpop.f32.mrf.mxu2 }
 0x122   :  { %v206_v42 = vadd.f32 %v312_v39, %v205_v38 }
 0x124   :  { %v213_v45 = vmax.f32 %v206_v42, 0.0 }
 0x129   :  { %v208_v40 = vpop.f32.mrf.mxu2 }
 0x12a   :  { %v209_v41 = vadd.f32 %v312_v39, %v208_v40 }
 0x12c   :  { %v214_v43 = vmax.f32 %v209_v41, 0.0 }
 0x12e   :  { %284 = vmatpush.xpose.msk.msra.mxu3 %vm169_vm2, %v214_v43 }
 0x132   :  { %285 = vmatpush.xpose.msk.msra.mxu3 %vm169_vm2, %v213_v45 }
 0x136   :  { %286 = vmatpush.xpose.msk.msra.mxu3 %vm169_vm2, %v212_v47 }
 0x13a   :  { %287 = vmatpush.xpose.msk.msra.mxu3 %vm169_vm2, %v211_v48 }
 0x13d   :  { %288 = vmatmul.msk.f32.vlgmr.msra.gmra.mxu3 %vm169_vm2, %v215_v49 }
 0x1c0   :  { %v250_v51 = vpop.f32.mrf.mxu3 }
 0x1c1   :  { %v251_v52 = vadd.f32 %v250_v51, %v217_v50 }
 0x1c3   :  { %254 = vst.msk [vmem:[#allocation6] sm:$0x1] %vm253_vm3, %v251_v52 }
 0x1c4   :  { %265 = dma.vmem_to_hbm [thread:$0]  %s261_s15, 16, %s263_s18, [#allocation5]  }
 0x1c5   :  { %363 = dma.done.wait [#allocation5], 16  }
 0x1c6   :  { %364 = vsyncadd [#allocation5], 4294967280 }
 0x1c7   :  { %270 = vsyncpa [#allocation4], 1 }
 0x1c8   :  { %271 = vsyncpa [#allocation5], 1 }

</bundles_post_ra>
